<compile_context>
chip_gen: v7x
topology: tpu7x:2x2x1
jax: 0.10.0
libtpu: 0.0.40
codegen_flags: <defaults>
</compile_context>

<pallas_src>
import functools

import jax
import jax.numpy as jnp
from jax.experimental import pallas as pl
from jax.experimental.pallas import tpu as pltpu

IMG_SHAPE = (1, 28, 28)
IN_DIM = 1 * 28 * 28   # 784
H1 = 512
H2 = 256
OUT = 1


def _discriminator_kernel(x_ref, w1_ref, b1_ref, w2_ref, b2_ref,
                          w3_ref, b3_ref, o_ref, *, bf16_epilogue):
    # x arrives as f32 (no wrapper-side cast pass over HBM); cast in-VMEM.
    x = x_ref[...].astype(jnp.bfloat16)                          # (TILE_B, 784)

    def epilogue(acc_f32, b_ref):
        if bf16_epilogue:
            # v6e/v7x option: bf16 VALU halves epilogue vector ops / spills.
            h = acc_f32.astype(jnp.bfloat16) + b_ref[...].astype(jnp.bfloat16)
        else:
            h = acc_f32 + b_ref[...]
        h = jnp.maximum(h, 0.2 * h)                              # LeakyReLU(0.2)
        return h.astype(jnp.bfloat16)

    # Linear(784 -> 512) + LeakyReLU(0.2): bf16 operands, f32 MXU accumulation.
    h1 = epilogue(jnp.dot(x, w1_ref[...],
                          preferred_element_type=jnp.float32), b1_ref)

    # Linear(512 -> 256) + LeakyReLU(0.2)
    h2 = epilogue(jnp.dot(h1, w2_ref[...],
                          preferred_element_type=jnp.float32), b2_ref)

    # Linear(256 -> 1) + Sigmoid, produced as a lane-dense (1, TILE_B) row:
    # contract the feature axis of w3 (1, 256) with the feature axis of h2.
    h3 = jax.lax.dot_general(
        w3_ref[...], h2,
        dimension_numbers=(((1,), (1,)), ((), ())),
        preferred_element_type=jnp.float32)                      # (1, TILE_B)
    h3 = h3 + b3_ref[0, 0]
    o_ref[...] = jax.nn.sigmoid(h3).reshape(o_ref.shape).astype(o_ref.dtype)


def _choose_batch_tiling(batch, target_tile_b):
    """Return (tile_b, padded_batch).

    tile_b is a multiple of 8 (f32 sublane), padding is minimal (tile count is
    fixed first, tile size derived from it), and the grid has >= 2 steps when
    the batch is large enough so v7x megacore can split the "parallel" axis.
    """
    target = max(8, (target_tile_b // 8) * 8)
    b8 = ((batch + 7) // 8) * 8                      # minimal sublane padding
    if b8 <= target:
        if b8 >= 16:
            # Split small/medium batches into two equal tiles (megacore).
            b16 = ((batch + 15) // 16) * 16
            return b16 // 2, b16
        return b8, b8
    num_tiles = pl.cdiv(b8, target)
    tile_b = ((pl.cdiv(b8, num_tiles) + 7) // 8) * 8
    return tile_b, num_tiles * tile_b


def prepare_params(params):
    """One-time conversion of f32 master params to the kernel's layout/dtypes.

    Call this once (outside the training / inference loop) so the forward pass
    launches no per-call weight-cast kernels.
    """
    w1, b1, w2, b2, w3, b3 = params
    return (
        w1.astype(jnp.bfloat16),                     # (784, 512)
        b1.reshape(1, H1).astype(jnp.float32),       # (1, 512)
        w2.astype(jnp.bfloat16),                     # (512, 256)
        b2.reshape(1, H2).astype(jnp.float32),       # (1, 256)
        w3.reshape(OUT, H2).astype(jnp.bfloat16),    # (1, 256) row
        b3.reshape(1, 1).astype(jnp.float32),        # scalar via SMEM
    )


def discriminator_forward(img, prepared_params, *, target_tile_b=1024,
                          bf16_epilogue=False):
    """img: (B, 1, 28, 28) f32 NCHW; prepared_params from prepare_params().
    Returns (B, 1) validity in f32."""
    B = img.shape[0]
    w1_bf, b1_f, w2_bf, b2_f, w3_row, b3_s = prepared_params

    x = img.reshape(B, -1)                           # (B, 784), like torch .view
    tile_b, b_pad = _choose_batch_tiling(B, target_tile_b)
    if b_pad != B:
        # Tiling above minimizes this; only a few rows of zero padding when the
        # batch size is awkward (padded rows' outputs are sliced off below).
        x = jnp.pad(x, ((0, b_pad - B), (0, 0)))
    num_tiles = b_pad // tile_b

    kernel = functools.partial(_discriminator_kernel,
                               bf16_epilogue=bf16_epilogue)

    def resident(shape):
        # Constant index map: weights stay VMEM-resident, DMA'd once.
        return pl.BlockSpec(shape, lambda i: (0,) * len(shape))

    out = pl.pallas_call(
        kernel,
        out_shape=jax.ShapeDtypeStruct((num_tiles, 1, tile_b), jnp.float32),
        grid_spec=pltpu.PrefetchScalarGridSpec(
            num_scalar_prefetch=0,
            grid=(num_tiles,),
            in_specs=[
                pl.BlockSpec((tile_b, IN_DIM), lambda i: (i, 0)),   # x: batch-tiled, f32
                resident((IN_DIM, H1)),                             # w1 (bf16, resident)
                resident((1, H1)),                                  # b1 (f32)
                resident((H1, H2)),                                 # w2
                resident((1, H2)),                                  # b2
                resident((OUT, H2)),                                # w3 row
                pl.BlockSpec(memory_space=pltpu.MemorySpace.SMEM),  # b3 scalar
            ],
            out_specs=pl.BlockSpec((1, 1, tile_b), lambda i: (i, 0, 0)),
        ),
        compiler_params=pltpu.CompilerParams(
            dimension_semantics=("parallel",),       # batch tiles across TCs
        ),
    )(x, w1_bf, b1_f, w2_bf, b2_f, w3_row, b3_s)

    return out.reshape(-1)[:B].reshape(B, OUT)


def init_params(key):
    """Deterministic init mimicking torch.nn.Linear (uniform +-1/sqrt(fan_in)).
    Weights stored as (in_features, out_features), f32 master copies."""
    ks = jax.random.split(key, 6)

    def linear(kw, kb, fan_in, fan_out):
        bound = 1.0 / jnp.sqrt(jnp.float32(fan_in))
        w = jax.random.uniform(kw, (fan_in, fan_out), jnp.float32, -bound, bound)
        b = jax.random.uniform(kb, (fan_out,), jnp.float32, -bound, bound)
        return w, b

    w1, b1 = linear(ks[0], ks[1], IN_DIM, H1)
    w2, b2 = linear(ks[2], ks[3], H1, H2)
    w3, b3 = linear(ks[4], ks[5], H2, OUT)
    return (w1, b1, w2, b2, w3, b3)


def _reference_forward(img, params):
    """Pure-JAX reference applying the same bf16-operand / f32-accum recipe."""
    w1, b1, w2, b2, w3, b3 = params
    x = img.reshape(img.shape[0], -1).astype(jnp.bfloat16)
    h1 = jnp.dot(x, w1.astype(jnp.bfloat16),
                 preferred_element_type=jnp.float32) + b1[None, :]
    h1 = jnp.maximum(h1, 0.2 * h1)
    h2 = jnp.dot(h1.astype(jnp.bfloat16), w2.astype(jnp.bfloat16),
                 preferred_element_type=jnp.float32) + b2[None, :]
    h2 = jnp.maximum(h2, 0.2 * h2)
    h3 = jnp.dot(h2.astype(jnp.bfloat16), w3.astype(jnp.bfloat16),
                 preferred_element_type=jnp.float32) + b3[None, :]
    return jax.nn.sigmoid(h3)


if __name__ == "__main__":
    key = jax.random.PRNGKey(0)
    k_img, k_img2, k_params = jax.random.split(key, 3)

    params = init_params(k_params)
    prepared = prepare_params(params)   # cast/reshape weights once, not per call

    # Small single-tile batch.
    B = 8
    img = jax.random.normal(k_img, (B,) + IMG_SHAPE, dtype=jnp.float32)
    out = jax.block_until_ready(discriminator_forward(img, prepared))
    ref = _reference_forward(img, params)
    assert out.shape == (B, OUT), out.shape
    assert jnp.allclose(out, ref, atol=1e-3, rtol=1e-3), "mismatch vs reference (B=8)"

    # Multi-tile path (exercises padding, 2 grid steps, output slicing).
    B2 = 40
    img2 = jax.random.normal(k_img2, (B2,) + IMG_SHAPE, dtype=jnp.float32)
    out2 = jax.block_until_ready(discriminator_forward(img2, prepared))
    ref2 = _reference_forward(img2, params)
    assert out2.shape == (B2, OUT), out2.shape
    assert jnp.allclose(out2, ref2, atol=1e-3, rtol=1e-3), "mismatch vs reference (B=40)"

    print("KERNEL_OK")
</pallas_src>

<mosaic_0001>
module attributes {stable_mosaic.version = 11 : i64} {
  func.func @_discriminator_kernel(%arg0: i32, %arg1: memref<8x784xf32, #tpu.memory_space<vmem>>, %arg2: memref<784x512xbf16, #tpu.memory_space<vmem>>, %arg3: memref<1x512xf32, #tpu.memory_space<vmem>>, %arg4: memref<512x256xbf16, #tpu.memory_space<vmem>>, %arg5: memref<1x256xf32, #tpu.memory_space<vmem>>, %arg6: memref<1x256xbf16, #tpu.memory_space<vmem>>, %arg7: memref<1x1xf32, #tpu.memory_space<smem>>, %arg8: memref<1x1x8xf32, #tpu.memory_space<vmem>>) attributes {dimension_semantics = [#tpu.dimension_semantics<parallel>], iteration_bounds = array<i64: 1>, scalar_prefetch = 0 : i64, scratch_operands = 0 : i64, tpu.core_type = #tpu.core_type<tc>, window_params = [{transform_indices = @transform_0, window_bounds = array<i64: 8, 784>}, {pipeline_mode = #tpu.pipeline_mode<synchronous>, transform_indices = @transform_1, window_bounds = array<i64: 784, 512>}, {pipeline_mode = #tpu.pipeline_mode<synchronous>, transform_indices = @transform_2, window_bounds = array<i64: 1, 512>}, {pipeline_mode = #tpu.pipeline_mode<synchronous>, transform_indices = @transform_3, window_bounds = array<i64: 512, 256>}, {pipeline_mode = #tpu.pipeline_mode<synchronous>, transform_indices = @transform_4, window_bounds = array<i64: 1, 256>}, {pipeline_mode = #tpu.pipeline_mode<synchronous>, transform_indices = @transform_5, window_bounds = array<i64: 1, 256>}, {transform_indices = @transform_6, window_bounds = array<i64: 1, 1>}, {transform_indices = @transform_7, window_bounds = array<i64: 1, 1, 8>}]} {
    %c0 = arith.constant 0 : index
    %c0_0 = arith.constant 0 : index
    %0 = vector.load %arg1[%c0, %c0_0] : memref<8x784xf32, #tpu.memory_space<vmem>>, vector<8x784xf32>
    %1 = arith.truncf %0 : vector<8x784xf32> to vector<8x784xbf16>
    %c0_1 = arith.constant 0 : index
    %c0_2 = arith.constant 0 : index
    %2 = vector.load %arg2[%c0_1, %c0_2] : memref<784x512xbf16, #tpu.memory_space<vmem>>, vector<784x512xbf16>
    %cst = arith.constant dense<0.000000e+00> : vector<8x512xf32>
    %3 = tpu.matmul %1, %2, %cst {dimension_numbers = #tpu.dot_dimension_numbers<[1], [0], [0], [1], [0, 0, 1, 1], [], []>} : vector<8x784xbf16>, vector<784x512xbf16>, vector<8x512xf32> -> vector<8x512xf32>
    %c0_3 = arith.constant 0 : index
    %c0_4 = arith.constant 0 : index
    %4 = vector.load %arg3[%c0_3, %c0_4] : memref<1x512xf32, #tpu.memory_space<vmem>>, vector<1x512xf32>
    %5 = vector.broadcast %4 : vector<1x512xf32> to vector<8x512xf32>
    %6 = arith.addf %3, %5 : vector<8x512xf32>
    %cst_5 = arith.constant 2.000000e-01 : f32
    %7 = vector.broadcast %cst_5 : f32 to vector<8x512xf32>
    %8 = arith.mulf %7, %6 : vector<8x512xf32>
    %9 = arith.maximumf %6, %8 : vector<8x512xf32>
    %10 = arith.truncf %9 : vector<8x512xf32> to vector<8x512xbf16>
    %c0_6 = arith.constant 0 : index
    %c0_7 = arith.constant 0 : index
    %11 = vector.load %arg4[%c0_6, %c0_7] : memref<512x256xbf16, #tpu.memory_space<vmem>>, vector<512x256xbf16>
    %cst_8 = arith.constant dense<0.000000e+00> : vector<8x256xf32>
    %12 = tpu.matmul %10, %11, %cst_8 {dimension_numbers = #tpu.dot_dimension_numbers<[1], [0], [0], [1], [0, 0, 1, 1], [], []>} : vector<8x512xbf16>, vector<512x256xbf16>, vector<8x256xf32> -> vector<8x256xf32>
    %c0_9 = arith.constant 0 : index
    %c0_10 = arith.constant 0 : index
    %13 = vector.load %arg5[%c0_9, %c0_10] : memref<1x256xf32, #tpu.memory_space<vmem>>, vector<1x256xf32>
    %14 = vector.broadcast %13 : vector<1x256xf32> to vector<8x256xf32>
    %15 = arith.addf %12, %14 : vector<8x256xf32>
    %cst_11 = arith.constant 2.000000e-01 : f32
    %16 = vector.broadcast %cst_11 : f32 to vector<8x256xf32>
    %17 = arith.mulf %16, %15 : vector<8x256xf32>
    %18 = arith.maximumf %15, %17 : vector<8x256xf32>
    %19 = arith.truncf %18 : vector<8x256xf32> to vector<8x256xbf16>
    %c0_12 = arith.constant 0 : index
    %c0_13 = arith.constant 0 : index
    %20 = vector.load %arg6[%c0_12, %c0_13] : memref<1x256xbf16, #tpu.memory_space<vmem>>, vector<1x256xbf16>
    %cst_14 = arith.constant dense<0.000000e+00> : vector<1x8xf32>
    %21 = tpu.matmul %20, %19, %cst_14 {dimension_numbers = #tpu.dot_dimension_numbers<[1], [1], [0], [0], [0, 0, 1, 0], [], []>} : vector<1x256xbf16>, vector<8x256xbf16>, vector<1x8xf32> -> vector<1x8xf32>
    %c0_15 = arith.constant 0 : index
    %c0_16 = arith.constant 0 : index
    %22 = memref.load %arg7[%c0_15, %c0_16] : memref<1x1xf32, #tpu.memory_space<smem>>
    %23 = vector.broadcast %22 : f32 to vector<1x8xf32>
    %24 = arith.addf %21, %23 : vector<1x8xf32>
    %25 = arith.negf %24 : vector<1x8xf32>
    %26 = math.exp %25 : vector<1x8xf32>
    %cst_17 = arith.constant 1.000000e+00 : f32
    %27 = vector.broadcast %cst_17 : f32 to vector<1x8xf32>
    %28 = arith.addf %27, %26 : vector<1x8xf32>
    %29 = arith.divf %27, %28 : vector<1x8xf32>
    %30 = vector.shape_cast %29 : vector<1x8xf32> to vector<1x1x8xf32>
    %c0_18 = arith.constant 0 : index
    %c0_19 = arith.constant 0 : index
    %c0_20 = arith.constant 0 : index
    %31 = vector.load %arg8[%c0_18, %c0_19, %c0_20] : memref<1x1x8xf32, #tpu.memory_space<vmem>>, vector<1x1x8xf32>
    tpu.vector_store %arg8[%c0_18, %c0_19, %c0_20], %30 {strides = array<i32>} : memref<1x1x8xf32, #tpu.memory_space<vmem>>, vector<1x1x8xf32>,
    return
  }
  func.func @transform_0(%arg0: i32) -> (i32, i32) {
    %c0_i32 = arith.constant 0 : i32
    %c0_i32_0 = arith.constant 0 : i32
    return %arg0, %c0_i32 : i32, i32
  }
  func.func @transform_1(%arg0: i32) -> (i32, i32) {
    %c0_i32 = arith.constant 0 : i32
    %c0_i32_0 = arith.constant 0 : i32
    %c0_i32_1 = arith.constant 0 : i32
    return %c0_i32, %c0_i32_0 : i32, i32
  }
  func.func @transform_2(%arg0: i32) -> (i32, i32) {
    %c0_i32 = arith.constant 0 : i32
    %c0_i32_0 = arith.constant 0 : i32
    %c0_i32_1 = arith.constant 0 : i32
    return %c0_i32, %c0_i32_0 : i32, i32
  }
  func.func @transform_3(%arg0: i32) -> (i32, i32) {
    %c0_i32 = arith.constant 0 : i32
    %c0_i32_0 = arith.constant 0 : i32
    %c0_i32_1 = arith.constant 0 : i32
    return %c0_i32, %c0_i32_0 : i32, i32
  }
  func.func @transform_4(%arg0: i32) -> (i32, i32) {
    %c0_i32 = arith.constant 0 : i32
    %c0_i32_0 = arith.constant 0 : i32
    %c0_i32_1 = arith.constant 0 : i32
    return %c0_i32, %c0_i32_0 : i32, i32
  }
  func.func @transform_5(%arg0: i32) -> (i32, i32) {
    %c0_i32 = arith.constant 0 : i32
    %c0_i32_0 = arith.constant 0 : i32
    %c0_i32_1 = arith.constant 0 : i32
    return %c0_i32, %c0_i32_0 : i32, i32
  }
  func.func @transform_6(%arg0: i32) -> (i32, i32) {
    %c0_i32 = arith.constant 0 : i32
    %c0_i32_0 = arith.constant 0 : i32
    %c0_i32_1 = arith.constant 0 : i32
    return %c0_i32, %c0_i32_0 : i32, i32
  }
  func.func @transform_7(%arg0: i32) -> (i32, i32, i32) {
    %c0_i32 = arith.constant 0 : i32
    %c0_i32_0 = arith.constant 0 : i32
    %c0_i32_1 = arith.constant 0 : i32
    return %arg0, %c0_i32, %c0_i32_0 : i32, i32, i32
  }
}

</mosaic_0001>

<bundles_post_ra>
// kernel: tpu_custom_call.1
= control target key start
LH: loop header
LB: loop body
LE: loop exit
PB: predicated region body
PF: predicated region fallthrough
CT: control target
= control target key end

     0   :  { %13 = vsyncpa [#allocation4], 0  ;;  %s3157_s0 = inlined_call_operand.hbm [shape: f32[8,784], index: 0, kind: input, shape index: {}]   ;;  %s3158_s1 = inlined_call_operand.hbm [shape: bf16[784,512], index: 1, kind: input, shape index: {}]   ;;  %s3159_s2 = inlined_call_operand.vmem [shape: f32[1,512], index: 2, kind: input, shape index: {}]   ;;  %s3160_s3 = inlined_call_operand.hbm [shape: bf16[512,256], index: 3, kind: input, shape index: {}]   ;;  %s3161_s4 = inlined_call_operand.vmem [shape: f32[1,256], index: 4, kind: input, shape index: {}]   ;;  %s3162_s5 = inlined_call_operand.vmem [shape: bf16[1,256], index: 5, kind: input, shape index: {}]   ;;  %s3163_s6 = inlined_call_operand.<no memory space> [shape: f32[1,1], index: 6, kind: input, shape index: {}]   ;;  %s3164_s7 = inlined_call_operand.hbm [shape: f32[1,1,8], index: 7, kind: output, shape index: {}]  }
   0x1   :  { %14 = vsyncpa [#allocation7], 0 }
   0x2   :  { %15 = vsyncpa [#allocation5], 0  ;;  %s2994_s24 = smov [#allocation6]   ;;  %s2900_s28 = scalar_lea.hbm %s3158_s1, 25088 }
   0x3   :  { %s31_s25 = sshll.u32 %s2994_s24, 4  ;;  %p2901_p0 = scmp.ne.s32.totalorder %s3158_s1, %s2900_s28  ;;  %s32_s25 = int_to_ptr.vmem [resolvable:$true] %s31_s25 }
   0x4   :  { %p2904_p1 = scmp.lt.u32.totalorder %s2900_s28, %s3158_s1 }
   0x6   :  { %p2906_p2 = pnand %p2904_p1, %p2901_p0 }
   0x8   :  { %2909 = shalt.err (!%p2906_p2)
}
   0x9   :  { %s2910_s10 = scalar_lea.vmem %s32_s25, 25088  ;;  %p2915_p4 = scmp.lt.s32.totalorder %s32_s25, %s32_s25 }
   0xa   :  { %p2911_p3 = scmp.ne.s32.totalorder %s32_s25, %s2910_s10  ;;  %p2916_p5 = scmp.lt.s32.totalorder %s2910_s10, %s2910_s10 }
   0xc   :  { %p2917_p6 = por %p2916_p5, %p2915_p4 }
   0xe   :  { %p2918_p7 = pnand %p2917_p6, %p2911_p3 }
  0x10   :  { %2921 = shalt.err (!%p2918_p7)
}
  0x11   :  { %s2995_s11 = smov 256   ;;  %s2996_s12 = smov 16  }
  0x12   :  { %37 = dma.hbm_to_vmem [thread:$0]  %s3158_s1, 25088, %s32_s25, [#allocation7], %s2995_s11, %s2995_s11, %s2996_s12  }
  0x13   :  { %s2997_s15 = smov [#allocation3]   ;;  %s2998_s17 = smov [#allocation8]  }
  0x14   :  { %s22_s16 = sshll.u32 %s2997_s15, 4  ;;  %s45_s18 = sshll.u32 %s2998_s17, 4  ;;  %s23_s16 = int_to_ptr.vmem [resolvable:$true] %s22_s16  ;;  %s46_s18 = int_to_ptr.vmem [resolvable:$true] %s45_s18 }
  0x15   :  { %s2922_s21 = scalar_lea.hbm %s3157_s0, 896 }
  0x16   :  { %p2923_p8 = scmp.ne.s32.totalorder %s3157_s0, %s2922_s21  ;;  %p2926_p9 = scmp.lt.u32.totalorder %s2922_s21, %s3157_s0 }
  0x18   :  { %p2928_p10 = pnand %p2926_p9, %p2923_p8 }
  0x1a   :  { %2931 = shalt.err (!%p2928_p10)
}
  0x1b   :  { %s2932_s1 = scalar_lea.vmem %s23_s16, 896  ;;  %p2937_p12 = scmp.lt.s32.totalorder %s23_s16, %s23_s16 }
  0x1c   :  { %p2933_p11 = scmp.ne.s32.totalorder %s23_s16, %s2932_s1  ;;  %p2938_p13 = scmp.lt.s32.totalorder %s2932_s1, %s2932_s1 }
  0x1e   :  { %p2939_p0 = por %p2938_p13, %p2937_p12 }
  0x20   :  { %p2940_p1 = pnand %p2939_p0, %p2933_p11 }
  0x22   :  { %2943 = shalt.err (!%p2940_p1)
}
  0x23   :  { %25 = dma.hbm_to_vmem [thread:$0]  %s3157_s0, 896, %s23_s16, [#allocation4]  }
  0x24   :  { %s2944_s30 = scalar_lea.hbm %s3160_s3, 8192 }
  0x25   :  { %p2945_p2 = scmp.ne.s32.totalorder %s3160_s3, %s2944_s30  ;;  %p2948_p3 = scmp.lt.u32.totalorder %s2944_s30, %s3160_s3 }
  0x27   :  { %p2950_p4 = pnand %p2948_p3, %p2945_p2 }
  0x29   :  { %2953 = shalt.err (!%p2950_p4)
}
  0x2a   :  { %s2954_s12 = scalar_lea.vmem %s46_s18, 8192  ;;  %p2959_p6 = scmp.lt.s32.totalorder %s46_s18, %s46_s18 }
  0x2b   :  { %p2955_p5 = scmp.ne.s32.totalorder %s46_s18, %s2954_s12  ;;  %p2960_p7 = scmp.lt.s32.totalorder %s2954_s12, %s2954_s12 }
  0x2d   :  { %p2961_p8 = por %p2960_p7, %p2959_p6 }
  0x2f   :  { %p2962_p9 = pnand %p2961_p8, %p2955_p5 }
  0x31   :  { %2965 = shalt.err (!%p2962_p9)
}
  0x32   :  { %s2999_s0 = smov 128   ;;  %s3000_s13 = smov 8  }
  0x33   :  { %51 = dma.hbm_to_vmem [thread:$0]  %s3160_s3, 8192, %s46_s18, [#allocation7], %s2999_s0, %s2999_s0, %s3000_s13  }
  0x34   :  { %2988 = dma.done.wait [#allocation4], 896  }
  0x35   :  { %2989 = vsyncadd [#allocation4], 4294966400 }
  0x36   :  { %2990 = dma.done.wait [#allocation7], 33280  }
  0x37   :  { %2991 = vsyncadd [#allocation7], 4294934016  ;;  %v2506_v0 = vld [vmem:[#allocation6 + $0x4] ss:$16 sps:$4 sm:$0xff]   ;;  %v2510_v2 = vld [vmem:[#allocation6] ss:$16 sps:$4 sm:$0xff]  }
  0x38   :  { %v2508_v1 = vld [vmem:[#allocation6 + $0x204] ss:$16 sps:$4 sm:$0xff]   ;;  %1284 = vmatprep.subr.bf16.mxu1 %v2506_v0  ;;  %v2511_v3 = vld [vmem:[#allocation6 + $0x200] ss:$16 sps:$4 sm:$0xff]   ;;  %vm1280_vm0 = vcmask 130048   ;;  %s3003_s20 = smov [#allocation9]  }
  0x39   :  { %1325 = vmatprep.subr.bf16.mxu0 %v2508_v1  ;;  %v2512_v4 = vld [vmem:[#allocation6 + $0x24] ss:$16 sps:$4 sm:$0xff]   ;;  %1285 = vmatpush1.bf16.msra.mxu1 %v2510_v2  ;;  %v2516_v6 = vld [vmem:[#allocation6 + $0x20] ss:$16 sps:$4 sm:$0xff]   ;;  %s2190_s21 = sshll.u32 %s3003_s20, 4  ;;  %vm2182_vm1 = vcmask 57344   ;;  %s2191_s21 = int_to_ptr.vmem [resolvable:$true] %s2190_s21 }
  0x3a   :  { %1326 = vmatpush1.bf16.msra.mxu0 %v2511_v3  ;;  %v2514_v5 = vld [vmem:[#allocation6 + $0x224] ss:$16 sps:$4 sm:$0xff]   ;;  %1286 = vmatprep.subr.bf16.mxu1 %v2512_v4  ;;  %v2517_v7 = vld [vmem:[#allocation6 + $0x220] ss:$16 sps:$4 sm:$0xff]   ;;  %v68_v4 = vld [vmem:[#allocation3] sm:$0xff]  ;;  %s2966_s22 = scalar_lea.vmem %s2191_s21, 16  ;;  %p2971_p11 = scmp.lt.s32.totalorder %s2191_s21, %s2191_s21 }
  0x3b   :  { %1327 = vmatprep.subr.bf16.mxu0 %v2514_v5  ;;  %v2518_v8 = vld [vmem:[#allocation6 + $0x44] ss:$16 sps:$4 sm:$0xff]   ;;  %v2522_v10 = vld [vmem:[#allocation6 + $0x40] ss:$16 sps:$4 sm:$0xff]   ;;  %p2967_p10 = scmp.ne.s32.totalorder %s2191_s21, %s2966_s22  ;;  %s2970_s23 = scalar_lea.vmem %s2191_s21, 32 }
  0x3c   :  { %v2520_v9 = vld [vmem:[#allocation6 + $0x244] ss:$16 sps:$4 sm:$0xff]   ;;  %v2523_v11 = vld [vmem:[#allocation6 + $0x240] ss:$16 sps:$4 sm:$0xff]   ;;  %p2972_p12 = scmp.lt.s32.totalorder %s2970_s23, %s2966_s22 }
  0x3d   :  { %1287 = vmatpush1.bf16.msra.mxu1 %v2516_v6  ;;  %v2524_v12 = vld [vmem:[#allocation6 + $0x64] ss:$16 sps:$4 sm:$0xff]   ;;  %v2528_v14 = vld [vmem:[#allocation6 + $0x60] ss:$16 sps:$4 sm:$0xff]   ;;  %v70_v6 = vld [vmem:[#allocation3 + $0x10] sm:$0xff] }
  0x3e   :  { %1328 = vmatpush1.bf16.msra.mxu0 %v2517_v7  ;;  %1288 = vmatprep.subr.bf16.mxu1 %v2518_v8  ;;  %v2526_v13 = vld [vmem:[#allocation6 + $0x264] ss:$16 sps:$4 sm:$0xff]   ;;  %v2529_v15 = vld [vmem:[#allocation6 + $0x260] ss:$16 sps:$4 sm:$0xff]   ;;  %v2607_v7 = vld [vmem:[#allocation6 + $0xc] ss:$16 sps:$4 sm:$0xff]   ;;  %v3086_v8 = vpack.c.bf16 %v68_v4, %v68_v4  ;;  %p2973_p13 = por %p2972_p12, %p2971_p11 }
  0x3f   :  { %1329 = vmatprep.subr.bf16.mxu0 %v2520_v9  ;;  %v2530_v16 = vld [vmem:[#allocation6 + $0x84] ss:$16 sps:$4 sm:$0xff]   ;;  %v2534_v18 = vld [vmem:[#allocation6 + $0x80] ss:$16 sps:$4 sm:$0xff]   ;;  %v2691_v4 = vld [vmem:[#allocation6 + $0x1cc] ss:$16 sps:$4 sm:$0xff]  }
  0x40   :  { %v2532_v17 = vld [vmem:[#allocation6 + $0x284] ss:$16 sps:$4 sm:$0xff]   ;;  %v2535_v19 = vld [vmem:[#allocation6 + $0x280] ss:$16 sps:$4 sm:$0xff]   ;;  %p2974_p0 = pnand %p2973_p13, %p2967_p10 }
  0x41   :  { %1289 = vmatpush1.bf16.msra.mxu1 %v2522_v10  ;;  %v2536_v20 = vld [vmem:[#allocation6 + $0xa4] ss:$16 sps:$4 sm:$0xff]   ;;  %v2540_v22 = vld [vmem:[#allocation6 + $0xa0] ss:$16 sps:$4 sm:$0xff]   ;;  %v2605_v10 = vld [vmem:[#allocation6 + $0x8] ss:$16 sps:$4 sm:$0xff]  }
  0x42   :  { %1330 = vmatpush1.bf16.msra.mxu0 %v2523_v11  ;;  %1290 = vmatprep.subr.bf16.mxu1 %v2524_v12  ;;  %v2538_v21 = vld [vmem:[#allocation6 + $0x2a4] ss:$16 sps:$4 sm:$0xff]   ;;  %v2541_v23 = vld [vmem:[#allocation6 + $0x2a0] ss:$16 sps:$4 sm:$0xff]   ;;  %v3088_v11 = vpack.c.bf16 %v70_v6, %v70_v6  ;;  %v2689_v6 = vld [vmem:[#allocation6 + $0x1c8] ss:$16 sps:$4 sm:$0xff]  }
  0x43   :  { %1331 = vmatprep.subr.bf16.mxu0 %v2526_v13  ;;  %v2542_v24 = vld [vmem:[#allocation6 + $0xc4] ss:$16 sps:$4 sm:$0xff]   ;;  %v2546_v26 = vld [vmem:[#allocation6 + $0xc0] ss:$16 sps:$4 sm:$0xff]   ;;  %v2613_v13 = vld [vmem:[#allocation6 + $0x2c] ss:$16 sps:$4 sm:$0xff]  }
  0x44   :  { %v2544_v25 = vld [vmem:[#allocation6 + $0x2c4] ss:$16 sps:$4 sm:$0xff]   ;;  %v2547_v27 = vld [vmem:[#allocation6 + $0x2c0] ss:$16 sps:$4 sm:$0xff]  }
  0x45   :  { %1291 = vmatpush1.bf16.msra.mxu1 %v2528_v14  ;;  %v2548_v28 = vld [vmem:[#allocation6 + $0xe4] ss:$16 sps:$4 sm:$0xff]   ;;  %v2552_v30 = vld [vmem:[#allocation6 + $0xe0] ss:$16 sps:$4 sm:$0xff]  }
  0x46   :  { %1332 = vmatpush1.bf16.msra.mxu0 %v2529_v15  ;;  %1292 = vmatprep.subr.bf16.mxu1 %v2530_v16  ;;  %v2550_v29 = vld [vmem:[#allocation6 + $0x2e4] ss:$16 sps:$4 sm:$0xff]   ;;  %v2553_v31 = vld [vmem:[#allocation6 + $0x2e0] ss:$16 sps:$4 sm:$0xff]   ;;  %v2611_v15 = vld [vmem:[#allocation6 + $0x28] ss:$16 sps:$4 sm:$0xff]  }
  0x47   :  { %1333 = vmatprep.subr.bf16.mxu0 %v2532_v17  ;;  %v2554_v32 = vld [vmem:[#allocation6 + $0x104] ss:$16 sps:$4 sm:$0xff]   ;;  %v2558_v34 = vld [vmem:[#allocation6 + $0x100] ss:$16 sps:$4 sm:$0xff]   ;;  %v2619_v17 = vld [vmem:[#allocation6 + $0x4c] ss:$16 sps:$4 sm:$0xff]  }
  0x48   :  { %v2556_v33 = vld [vmem:[#allocation6 + $0x304] ss:$16 sps:$4 sm:$0xff]   ;;  %v2559_v35 = vld [vmem:[#allocation6 + $0x300] ss:$16 sps:$4 sm:$0xff]  }
  0x49   :  { %1293 = vmatpush1.bf16.msra.mxu1 %v2534_v18  ;;  %v2560_v36 = vld [vmem:[#allocation6 + $0x124] ss:$16 sps:$4 sm:$0xff]   ;;  %v2564_v38 = vld [vmem:[#allocation6 + $0x120] ss:$16 sps:$4 sm:$0xff]  }
  0x4a   :  { %1334 = vmatpush1.bf16.msra.mxu0 %v2535_v19  ;;  %1294 = vmatprep.subr.bf16.mxu1 %v2536_v20  ;;  %v2562_v37 = vld [vmem:[#allocation6 + $0x324] ss:$16 sps:$4 sm:$0xff]   ;;  %v2565_v39 = vld [vmem:[#allocation6 + $0x320] ss:$16 sps:$4 sm:$0xff]   ;;  %v2617_v19 = vld [vmem:[#allocation6 + $0x48] ss:$16 sps:$4 sm:$0xff]  }
  0x4b   :  { %1335 = vmatprep.subr.bf16.mxu0 %v2538_v21  ;;  %v2566_v40 = vld [vmem:[#allocation6 + $0x144] ss:$16 sps:$4 sm:$0xff]   ;;  %v2570_v42 = vld [vmem:[#allocation6 + $0x140] ss:$16 sps:$4 sm:$0xff]   ;;  %v2625_v21 = vld [vmem:[#allocation6 + $0x6c] ss:$16 sps:$4 sm:$0xff]  }
  0x4c   :  { %v2568_v41 = vld [vmem:[#allocation6 + $0x344] ss:$16 sps:$4 sm:$0xff]   ;;  %v2571_v43 = vld [vmem:[#allocation6 + $0x340] ss:$16 sps:$4 sm:$0xff]  }
  0x4d   :  { %1295 = vmatpush1.bf16.msra.mxu1 %v2540_v22  ;;  %v2572_v44 = vld [vmem:[#allocation6 + $0x164] ss:$16 sps:$4 sm:$0xff]   ;;  %v2576_v47 = vld [vmem:[#allocation6 + $0x160] ss:$16 sps:$4 sm:$0xff]  }
  0x4e   :  { %1336 = vmatpush1.bf16.msra.mxu0 %v2541_v23  ;;  %1296 = vmatprep.subr.bf16.mxu1 %v2542_v24  ;;  %v2574_v45 = vld [vmem:[#allocation6 + $0x364] ss:$16 sps:$4 sm:$0xff]   ;;  %v2577_v50 = vld [vmem:[#allocation6 + $0x360] ss:$16 sps:$4 sm:$0xff]   ;;  %v2623_v23 = vld [vmem:[#allocation6 + $0x68] ss:$16 sps:$4 sm:$0xff]  }
  0x4f   :  { %1337 = vmatprep.subr.bf16.mxu0 %v2544_v25  ;;  %v69_v46 = vld [vmem:[#allocation3 + $0x8] sm:$0xff]  ;;  %v71_v49 = vld [vmem:[#allocation3 + $0x18] sm:$0xff]  ;;  %v2631_v25 = vld [vmem:[#allocation6 + $0x8c] ss:$16 sps:$4 sm:$0xff]  }
  0x50   :  { %v3080_v48 = vpack.c.bf16 %v69_v46, %v69_v46  ;;  %v2578_v51 = vld [vmem:[#allocation6 + $0x184] ss:$16 sps:$4 sm:$0xff]   ;;  %v3082_v52 = vpack.c.bf16 %v71_v49, %v71_v49  ;;  %v2582_v54 = vld [vmem:[#allocation6 + $0x180] ss:$16 sps:$4 sm:$0xff]   ;;  %v2659_v49 = vld [vmem:[#allocation6 + $0x128] ss:$16 sps:$4 sm:$0xff]  }
  0x51   :  { %1297 = vmatpush1.bf16.msra.mxu1 %v2546_v26  ;;  %v2580_v53 = vld [vmem:[#allocation6 + $0x384] ss:$16 sps:$4 sm:$0xff]   ;;  %v2583_v55 = vld [vmem:[#allocation6 + $0x380] ss:$16 sps:$4 sm:$0xff]  }
  0x52   :  { %1338 = vmatpush1.bf16.msra.mxu0 %v2547_v27  ;;  %1298 = vmatprep.subr.bf16.mxu1 %v2548_v28  ;;  %v2584_v56 = vld [vmem:[#allocation6 + $0x1a4] ss:$16 sps:$4 sm:$0xff]   ;;  %v2588_v58 = vld [vmem:[#allocation6 + $0x1a0] ss:$16 sps:$4 sm:$0xff]   ;;  %v2629_v27 = vld [vmem:[#allocation6 + $0x88] ss:$16 sps:$4 sm:$0xff]  }
  0x53   :  { %1339 = vmatprep.subr.bf16.mxu0 %v2550_v29  ;;  %1316 = vmatprep.mubr.bf16.mxu1 %v3080_v48  ;;  %v2586_v57 = vld [vmem:[#allocation6 + $0x3a4] ss:$16 sps:$4 sm:$0xff]   ;;  %v2589_v59 = vld [vmem:[#allocation6 + $0x3a0] ss:$16 sps:$4 sm:$0xff]   ;;  %v2637_v29 = vld [vmem:[#allocation6 + $0xac] ss:$16 sps:$4 sm:$0xff]  }
  0x54   :  { %1357 = vmatprep.mubr.bf16.mxu0 %v3082_v52  ;;  %v2590_v60 = vld [vmem:[#allocation6 + $0x1c4] ss:$16 sps:$4 sm:$0xff]   ;;  %v2594_v62 = vld [vmem:[#allocation6 + $0x1c0] ss:$16 sps:$4 sm:$0xff]  }
  0x55   :  { %1299 = vmatpush1.bf16.msra.mxu1 %v2552_v30  ;;  %v2592_v61 = vld [vmem:[#allocation6 + $0x3c4] ss:$16 sps:$4 sm:$0xff]   ;;  %v2595_v63 = vld [vmem:[#allocation6 + $0x3c0] ss:$16 sps:$4 sm:$0xff]  }
  0x56   :  { %1340 = vmatpush1.bf16.msra.mxu0 %v2553_v31  ;;  %1300 = vmatprep.subr.bf16.mxu1 %v2554_v32  ;;  %v2596_v0 = vld [vmem:[#allocation6 + $0x1e4] ss:$16 sps:$4 sm:$0xff]   ;;  %v2600_v2 = vld [vmem:[#allocation6 + $0x1e0] ss:$16 sps:$4 sm:$0xff]   ;;  %v2635_v31 = vld [vmem:[#allocation6 + $0xa8] ss:$16 sps:$4 sm:$0xff]  }
  0x57   :  { %1341 = vmatprep.subr.bf16.mxu0 %v2556_v33  ;;  %v2598_v1 = vld [vmem:[#allocation6 + $0x3e4] ss:$16 sps:$4 sm:$0xff]   ;;  %v2601_v3 = vld [vmem:[#allocation6 + $0x3e0] ss:$16 sps:$4 sm:$0xff]   ;;  %v2643_v33 = vld [vmem:[#allocation6 + $0xcc] ss:$16 sps:$4 sm:$0xff]  }
  0x58   :  { %v2604_v5 = vld [vmem:[#allocation6 + $0x404] ss:$16 sps:$4 sm:$0xff]   ;;  %v2602_v9 = vld [vmem:[#allocation6 + $0x400] ss:$16 sps:$4 sm:$0xff]  }
  0x59   :  { %1301 = vmatpush1.bf16.msra.mxu1 %v2558_v34  ;;  %v2610_v12 = vld [vmem:[#allocation6 + $0x424] ss:$16 sps:$4 sm:$0xff]   ;;  %v2608_v14 = vld [vmem:[#allocation6 + $0x420] ss:$16 sps:$4 sm:$0xff]  }
  0x5a   :  { %1342 = vmatpush1.bf16.msra.mxu0 %v2559_v35  ;;  %1302 = vmatprep.subr.bf16.mxu1 %v2560_v36  ;;  %v2616_v16 = vld [vmem:[#allocation6 + $0x444] ss:$16 sps:$4 sm:$0xff]   ;;  %v2614_v18 = vld [vmem:[#allocation6 + $0x440] ss:$16 sps:$4 sm:$0xff]  }
  0x5b   :  { %1343 = vmatprep.subr.bf16.mxu0 %v2562_v37  ;;  %v2622_v20 = vld [vmem:[#allocation6 + $0x464] ss:$16 sps:$4 sm:$0xff]   ;;  %v2620_v22 = vld [vmem:[#allocation6 + $0x460] ss:$16 sps:$4 sm:$0xff]   ;;  %v2641_v37 = vld [vmem:[#allocation6 + $0xc8] ss:$16 sps:$4 sm:$0xff]  }
  0x5c   :  { %v2628_v24 = vld [vmem:[#allocation6 + $0x484] ss:$16 sps:$4 sm:$0xff]   ;;  %v2626_v26 = vld [vmem:[#allocation6 + $0x480] ss:$16 sps:$4 sm:$0xff]  }
  0x5d   :  { %1303 = vmatpush1.bf16.msra.mxu1 %v2564_v38  ;;  %v2634_v28 = vld [vmem:[#allocation6 + $0x4a4] ss:$16 sps:$4 sm:$0xff]   ;;  %v2632_v30 = vld [vmem:[#allocation6 + $0x4a0] ss:$16 sps:$4 sm:$0xff]  }
  0x5e   :  { %1344 = vmatpush1.bf16.msra.mxu0 %v2565_v39  ;;  %1304 = vmatprep.subr.bf16.mxu1 %v2566_v40  ;;  %v2640_v32 = vld [vmem:[#allocation6 + $0x4c4] ss:$16 sps:$4 sm:$0xff]   ;;  %v2638_v36 = vld [vmem:[#allocation6 + $0x4c0] ss:$16 sps:$4 sm:$0xff]   ;;  %v2649_v39 = vld [vmem:[#allocation6 + $0xec] ss:$16 sps:$4 sm:$0xff]  }
  0x5f   :  { %1345 = vmatprep.subr.bf16.mxu0 %v2568_v41  ;;  %v73_v34 = vld [vmem:[#allocation3 + $0x28] sm:$0xff]  ;;  %v2647_v41 = vld [vmem:[#allocation6 + $0xe8] ss:$16 sps:$4 sm:$0xff]  }
  0x60   :  { %v3093_v35 = vpack.c.bf16 %v73_v34, %v73_v34  ;;  %v2646_v38 = vld [vmem:[#allocation6 + $0x4e4] ss:$16 sps:$4 sm:$0xff]   ;;  %v2644_v40 = vld [vmem:[#allocation6 + $0x4e0] ss:$16 sps:$4 sm:$0xff]  }
  0x61   :  { %1305 = vmatpush1.bf16.msra.mxu1 %v2570_v42  ;;  %v2652_v42 = vld [vmem:[#allocation6 + $0x504] ss:$16 sps:$4 sm:$0xff]  }
  0x62   :  { %1346 = vmatpush1.bf16.msra.mxu0 %v2571_v43  ;;  %1306 = vmatprep.subr.bf16.mxu1 %v2572_v44  ;;  %v2655_v43 = vld [vmem:[#allocation6 + $0x10c] ss:$16 sps:$4 sm:$0xff]   ;;  %v2650_v44 = vld [vmem:[#allocation6 + $0x500] ss:$16 sps:$4 sm:$0xff]   ;;  %v2658_v46 = vld [vmem:[#allocation6 + $0x524] ss:$16 sps:$4 sm:$0xff]  }
  0x63   :  { %1347 = vmatprep.subr.bf16.mxu0 %v2574_v45  ;;  %v2653_v45 = vld [vmem:[#allocation6 + $0x108] ss:$16 sps:$4 sm:$0xff]   ;;  %v2802_v34 = vld [vmem:[#allocation8 + $0x4] ss:$8 sps:$4 sm:$0xff]  }
  0x65   :  { %1307 = vmatpush1.bf16.msra.mxu1 %v2576_v47  ;;  %v2661_v47 = vld [vmem:[#allocation6 + $0x12c] ss:$16 sps:$4 sm:$0xff]  }
  0x66   :  { %1348 = vmatpush1.bf16.msra.mxu0 %v2577_v50  ;;  %1308 = vmatprep.subr.bf16.mxu1 %v2578_v51  ;;  %v2664_v50 = vld [vmem:[#allocation6 + $0x544] ss:$16 sps:$4 sm:$0xff]   ;;  %v2667_v51 = vld [vmem:[#allocation6 + $0x14c] ss:$16 sps:$4 sm:$0xff]  }
  0x67   :  { %1349 = vmatprep.subr.bf16.mxu0 %v2580_v53  ;;  %v2662_v53 = vld [vmem:[#allocation6 + $0x540] ss:$16 sps:$4 sm:$0xff]  }
  0x69   :  { %1309 = vmatpush1.bf16.msra.mxu1 %v2582_v54  ;;  %v2665_v54 = vld [vmem:[#allocation6 + $0x148] ss:$16 sps:$4 sm:$0xff]  }
  0x6a   :  { %1350 = vmatpush1.bf16.msra.mxu0 %v2583_v55  ;;  %1310 = vmatprep.subr.bf16.mxu1 %v2584_v56  ;;  %v2670_v55 = vld [vmem:[#allocation6 + $0x564] ss:$16 sps:$4 sm:$0xff]   ;;  %v2673_v56 = vld [vmem:[#allocation6 + $0x16c] ss:$16 sps:$4 sm:$0xff]  }
  0x6b   :  { %1351 = vmatprep.subr.bf16.mxu0 %v2586_v57  ;;  %v2668_v57 = vld [vmem:[#allocation6 + $0x560] ss:$16 sps:$4 sm:$0xff]  }
  0x6d   :  { %1311 = vmatpush1.bf16.msra.mxu1 %v2588_v58  ;;  %v2671_v58 = vld [vmem:[#allocation6 + $0x168] ss:$16 sps:$4 sm:$0xff]  }
  0x6e   :  { %1352 = vmatpush1.bf16.msra.mxu0 %v2589_v59  ;;  %1312 = vmatprep.subr.bf16.mxu1 %v2590_v60  ;;  %v2676_v59 = vld [vmem:[#allocation6 + $0x584] ss:$16 sps:$4 sm:$0xff]   ;;  %v2679_v60 = vld [vmem:[#allocation6 + $0x18c] ss:$16 sps:$4 sm:$0xff]  }
  0x6f   :  { %1353 = vmatprep.subr.bf16.mxu0 %v2592_v61  ;;  %v2674_v61 = vld [vmem:[#allocation6 + $0x580] ss:$16 sps:$4 sm:$0xff]  }
  0x71   :  { %1313 = vmatpush1.bf16.msra.mxu1 %v2594_v62  ;;  %v2677_v62 = vld [vmem:[#allocation6 + $0x188] ss:$16 sps:$4 sm:$0xff]  }
  0x72   :  { %1354 = vmatpush1.bf16.msra.mxu0 %v2595_v63  ;;  %1314 = vmatprep.subr.bf16.mxu1 %v2596_v0  ;;  %v2682_v63 = vld [vmem:[#allocation6 + $0x5a4] ss:$16 sps:$4 sm:$0xff]   ;;  %v2685_v0 = vld [vmem:[#allocation6 + $0x1ac] ss:$16 sps:$4 sm:$0xff]  }
  0x73   :  { %1355 = vmatprep.subr.bf16.mxu0 %v2598_v1  ;;  %v2680_v1 = vld [vmem:[#allocation6 + $0x5a0] ss:$16 sps:$4 sm:$0xff]  }
  0x75   :  { %1315 = vmatpush1.bf16.msra.mxu1 %v2600_v2  ;;  %v2683_v2 = vld [vmem:[#allocation6 + $0x1a8] ss:$16 sps:$4 sm:$0xff]  }
  0x76   :  { %1356 = vmatpush1.bf16.msra.mxu0 %v2601_v3  ;;  %1448 = vmatprep.subr.bf16.mxu1 %v2607_v7  ;;  %v2688_v3 = vld [vmem:[#allocation6 + $0x5c4] ss:$16 sps:$4 sm:$0xff]  }
  0x77   :  { %1366 = vmatprep.subr.bf16.mxu0 %v2604_v5  ;;  %v2686_v5 = vld [vmem:[#allocation6 + $0x5c0] ss:$16 sps:$4 sm:$0xff]   ;;  %v2694_v7 = vld [vmem:[#allocation6 + $0x5e4] ss:$16 sps:$4 sm:$0xff]  }
  0x78   :  { %1317 = vmatmul.mubr.bf16.vlgmr.msra.gmra.mrb[0].mxu1 %v3086_v8 }
  0x79   :  { %1358 = vmatmul.mubr.bf16.vlgmr.msra.gmra.mrb[0].mxu0 %v3088_v11  ;;  %1449 = vmatpush1.bf16.msra.mxu1 %v2605_v10  ;;  %v2692_v10 = vld [vmem:[#allocation6 + $0x5e0] ss:$16 sps:$4 sm:$0xff]  }
  0x7a   :  { %1367 = vmatpush1.bf16.msra.mxu0 %v2602_v9  ;;  %1450 = vmatprep.subr.bf16.mxu1 %v2613_v13  ;;  %v2697_v9 = vld [vmem:[#allocation6 + $0x1ec] ss:$16 sps:$4 sm:$0xff]  }
  0x7b   :  { %1368 = vmatprep.subr.bf16.mxu0 %v2610_v12  ;;  %1480 = vmatprep.mubr.bf16.mxu1 %v3080_v48  ;;  %v2656_v48 = vld [vmem:[#allocation6 + $0x520] ss:$16 sps:$4 sm:$0xff]   ;;  %v2695_v12 = vld [vmem:[#allocation6 + $0x1e8] ss:$16 sps:$4 sm:$0xff]  }
  0x7c   :  { %1398 = vmatprep.mubr.bf16.mxu0 %v3093_v35  ;;  %v72_v13 = vld [vmem:[#allocation3 + $0x20] sm:$0xff] }
  0x7d   :  { %1451 = vmatpush1.bf16.msra.mxu1 %v2611_v15  ;;  %v2706_v15 = vld [vmem:[#allocation6 + $0x604] ss:$16 sps:$4 sm:$0xff]  }
  0x7e   :  { %1369 = vmatpush1.bf16.msra.mxu0 %v2608_v14  ;;  %1452 = vmatprep.subr.bf16.mxu1 %v2619_v17  ;;  %v2700_v14 = vld [vmem:[#allocation6 + $0x20c] ss:$16 sps:$4 sm:$0xff]   ;;  %v2698_v17 = vld [vmem:[#allocation6 + $0x208] ss:$16 sps:$4 sm:$0xff]  }
  0x7f   :  { %1370 = vmatprep.subr.bf16.mxu0 %v2616_v16  ;;  %v3096_v16 = vpack.c.bf16 %v72_v13, %v72_v13  ;;  %v2754_v13 = vld [vmem:[#allocation6 + $0x42c] ss:$16 sps:$4 sm:$0xff]  }
  0x81   :  { %1453 = vmatpush1.bf16.msra.mxu1 %v2617_v19  ;;  %v2703_v19 = vld [vmem:[#allocation6 + $0x22c] ss:$16 sps:$4 sm:$0xff]  }
  0x82   :  { %1371 = vmatpush1.bf16.msra.mxu0 %v2614_v18  ;;  %1454 = vmatprep.subr.bf16.mxu1 %v2625_v21  ;;  %v2704_v18 = vld [vmem:[#allocation6 + $0x600] ss:$16 sps:$4 sm:$0xff]   ;;  %v2709_v21 = vld [vmem:[#allocation6 + $0x24c] ss:$16 sps:$4 sm:$0xff]  }
  0x83   :  { %1372 = vmatprep.subr.bf16.mxu0 %v2622_v20  ;;  %v2701_v20 = vld [vmem:[#allocation6 + $0x228] ss:$16 sps:$4 sm:$0xff]  }
  0x85   :  { %1455 = vmatpush1.bf16.msra.mxu1 %v2623_v23  ;;  %v2707_v23 = vld [vmem:[#allocation6 + $0x248] ss:$16 sps:$4 sm:$0xff]  }
  0x86   :  { %1373 = vmatpush1.bf16.msra.mxu0 %v2620_v22  ;;  %1456 = vmatprep.subr.bf16.mxu1 %v2631_v25  ;;  %v3001_v22 = vmov 0   ;;  %v2712_v25 = vld [vmem:[#allocation6 + $0x26c] ss:$16 sps:$4 sm:$0xff]  }
  0x87   :  { %1374 = vmatprep.subr.bf16.mxu0 %v2628_v24  ;;  %v74_v24 = vld [vmem:[#allocation3 + $0x30] sm:$0xff] }
  0x89   :  { %1457 = vmatpush1.bf16.msra.mxu1 %v2629_v27  ;;  %v3102_v27 = vpack.c.bf16 %v74_v24, %v74_v24  ;;  %v2836_v24 = vld [vmem:[#allocation8 + $0xc0] ss:$8 sps:$4 sm:$0xff]  }
  0x8a   :  { %1375 = vmatpush1.bf16.msra.mxu0 %v2626_v26  ;;  %1458 = vmatprep.subr.bf16.mxu1 %v2637_v29  ;;  %v2710_v26 = vld [vmem:[#allocation6 + $0x268] ss:$16 sps:$4 sm:$0xff]   ;;  %v2718_v29 = vld [vmem:[#allocation6 + $0x2ac] ss:$16 sps:$4 sm:$0xff]  }
  0x8b   :  { %1376 = vmatprep.subr.bf16.mxu0 %v2634_v28  ;;  %v2715_v28 = vld [vmem:[#allocation6 + $0x28c] ss:$16 sps:$4 sm:$0xff]  }
  0x8d   :  { %1459 = vmatpush1.bf16.msra.mxu1 %v2635_v31  ;;  %v2721_v31 = vld [vmem:[#allocation6 + $0x2cc] ss:$16 sps:$4 sm:$0xff]  }
  0x8e   :  { %1377 = vmatpush1.bf16.msra.mxu0 %v2632_v30  ;;  %1460 = vmatprep.subr.bf16.mxu1 %v2643_v33  ;;  %v2716_v30 = vld [vmem:[#allocation6 + $0x2a8] ss:$16 sps:$4 sm:$0xff]  }
  0x8f   :  { %1378 = vmatprep.subr.bf16.mxu0 %v2640_v32  ;;  %v2724_v32 = vld [vmem:[#allocation6 + $0x2ec] ss:$16 sps:$4 sm:$0xff]   ;;  %v2800_v33 = vld [vmem:[#allocation8] ss:$8 sps:$4 sm:$0xff]  }
  0x91   :  { %1461 = vmatpush1.bf16.msra.mxu1 %v2641_v37  ;;  %v2722_v37 = vld [vmem:[#allocation6 + $0x2e8] ss:$16 sps:$4 sm:$0xff]  }
  0x92   :  { %1379 = vmatpush1.bf16.msra.mxu0 %v2638_v36  ;;  %1462 = vmatprep.subr.bf16.mxu1 %v2649_v39  ;;  %v2805_v36 = vld [vmem:[#allocation8 + $0x14] ss:$8 sps:$4 sm:$0xff]  }
  0x93   :  { %1380 = vmatprep.subr.bf16.mxu0 %v2646_v38  ;;  %v2803_v38 = vld [vmem:[#allocation8 + $0x10] ss:$8 sps:$4 sm:$0xff]   ;;  %v2727_v39 = vld [vmem:[#allocation6 + $0x30c] ss:$16 sps:$4 sm:$0xff]  }
  0x95   :  { %1463 = vmatpush1.bf16.msra.mxu1 %v2647_v41  ;;  %v2725_v41 = vld [vmem:[#allocation6 + $0x308] ss:$16 sps:$4 sm:$0xff]  }
  0x96   :  { %1381 = vmatpush1.bf16.msra.mxu0 %v2644_v40  ;;  %1464 = vmatprep.subr.bf16.mxu1 %v2655_v43  ;;  %v2808_v40 = vld [vmem:[#allocation8 + $0x24] ss:$8 sps:$4 sm:$0xff]  }
  0x97   :  { %1382 = vmatprep.subr.bf16.mxu0 %v2652_v42  ;;  %v2806_v42 = vld [vmem:[#allocation8 + $0x20] ss:$8 sps:$4 sm:$0xff]   ;;  %v2730_v43 = vld [vmem:[#allocation6 + $0x32c] ss:$16 sps:$4 sm:$0xff]  }
  0x99   :  { %1465 = vmatpush1.bf16.msra.mxu1 %v2653_v45  ;;  %v2728_v45 = vld [vmem:[#allocation6 + $0x328] ss:$16 sps:$4 sm:$0xff]  }
  0x9a   :  { %1383 = vmatpush1.bf16.msra.mxu0 %v2650_v44  ;;  %1466 = vmatprep.subr.bf16.mxu1 %v2661_v47  ;;  %v2811_v44 = vld [vmem:[#allocation8 + $0x34] ss:$8 sps:$4 sm:$0xff]  }
  0x9b   :  { %1384 = vmatprep.subr.bf16.mxu0 %v2658_v46  ;;  %v2809_v46 = vld [vmem:[#allocation8 + $0x30] ss:$8 sps:$4 sm:$0xff]   ;;  %v2733_v47 = vld [vmem:[#allocation6 + $0x34c] ss:$16 sps:$4 sm:$0xff]  }
  0x9d   :  { %1467 = vmatpush1.bf16.msra.mxu1 %v2659_v49  ;;  %v2731_v49 = vld [vmem:[#allocation6 + $0x348] ss:$16 sps:$4 sm:$0xff]  }
  0x9e   :  { %1385 = vmatpush1.bf16.msra.mxu0 %v2656_v48  ;;  %1468 = vmatprep.subr.bf16.mxu1 %v2667_v51  ;;  %v2814_v48 = vld [vmem:[#allocation8 + $0x44] ss:$8 sps:$4 sm:$0xff]  }
  0x9f   :  { %1386 = vmatprep.subr.bf16.mxu0 %v2664_v50  ;;  %v2812_v50 = vld [vmem:[#allocation8 + $0x40] ss:$8 sps:$4 sm:$0xff]   ;;  %v2736_v51 = vld [vmem:[#allocation6 + $0x36c] ss:$16 sps:$4 sm:$0xff]  }
  0xa1   :  { %1469 = vmatpush1.bf16.msra.mxu1 %v2665_v54  ;;  %v2734_v54 = vld [vmem:[#allocation6 + $0x368] ss:$16 sps:$4 sm:$0xff]  }
  0xa2   :  { %1387 = vmatpush1.bf16.msra.mxu0 %v2662_v53  ;;  %1470 = vmatprep.subr.bf16.mxu1 %v2673_v56  ;;  %v2817_v53 = vld [vmem:[#allocation8 + $0x54] ss:$8 sps:$4 sm:$0xff]  }
  0xa3   :  { %1388 = vmatprep.subr.bf16.mxu0 %v2670_v55  ;;  %v2815_v55 = vld [vmem:[#allocation8 + $0x50] ss:$8 sps:$4 sm:$0xff]   ;;  %v2739_v56 = vld [vmem:[#allocation6 + $0x38c] ss:$16 sps:$4 sm:$0xff]  }
  0xa5   :  { %1471 = vmatpush1.bf16.msra.mxu1 %v2671_v58  ;;  %v2737_v58 = vld [vmem:[#allocation6 + $0x388] ss:$16 sps:$4 sm:$0xff]  }
  0xa6   :  { %1389 = vmatpush1.bf16.msra.mxu0 %v2668_v57  ;;  %1472 = vmatprep.subr.bf16.mxu1 %v2679_v60  ;;  %v2820_v57 = vld [vmem:[#allocation8 + $0x64] ss:$8 sps:$4 sm:$0xff]  }
  0xa7   :  { %1390 = vmatprep.subr.bf16.mxu0 %v2676_v59  ;;  %v2818_v59 = vld [vmem:[#allocation8 + $0x60] ss:$8 sps:$4 sm:$0xff]   ;;  %v2742_v60 = vld [vmem:[#allocation6 + $0x3ac] ss:$16 sps:$4 sm:$0xff]  }
  0xa9   :  { %1473 = vmatpush1.bf16.msra.mxu1 %v2677_v62  ;;  %v2740_v62 = vld [vmem:[#allocation6 + $0x3a8] ss:$16 sps:$4 sm:$0xff]  }
  0xaa   :  { %1391 = vmatpush1.bf16.msra.mxu0 %v2674_v61  ;;  %1474 = vmatprep.subr.bf16.mxu1 %v2685_v0  ;;  %v2823_v61 = vld [vmem:[#allocation8 + $0x74] ss:$8 sps:$4 sm:$0xff]  }
  0xab   :  { %1392 = vmatprep.subr.bf16.mxu0 %v2682_v63  ;;  %v2821_v63 = vld [vmem:[#allocation8 + $0x70] ss:$8 sps:$4 sm:$0xff]   ;;  %v2745_v0 = vld [vmem:[#allocation6 + $0x3cc] ss:$16 sps:$4 sm:$0xff]  }
  0xad   :  { %1475 = vmatpush1.bf16.msra.mxu1 %v2683_v2  ;;  %v2743_v2 = vld [vmem:[#allocation6 + $0x3c8] ss:$16 sps:$4 sm:$0xff]  }
  0xae   :  { %1393 = vmatpush1.bf16.msra.mxu0 %v2680_v1  ;;  %1476 = vmatprep.subr.bf16.mxu1 %v2691_v4  ;;  %v2826_v1 = vld [vmem:[#allocation8 + $0x84] ss:$8 sps:$4 sm:$0xff]  }
  0xaf   :  { %1394 = vmatprep.subr.bf16.mxu0 %v2688_v3  ;;  %v2824_v3 = vld [vmem:[#allocation8 + $0x80] ss:$8 sps:$4 sm:$0xff]   ;;  %v2748_v4 = vld [vmem:[#allocation6 + $0x3ec] ss:$16 sps:$4 sm:$0xff]  }
  0xb1   :  { %1477 = vmatpush1.bf16.msra.mxu1 %v2689_v6  ;;  %v2746_v6 = vld [vmem:[#allocation6 + $0x3e8] ss:$16 sps:$4 sm:$0xff]  }
  0xb2   :  { %1395 = vmatpush1.bf16.msra.mxu0 %v2686_v5  ;;  %1478 = vmatprep.subr.bf16.mxu1 %v2697_v9  ;;  %v2829_v5 = vld [vmem:[#allocation8 + $0x94] ss:$8 sps:$4 sm:$0xff]  }
  0xb3   :  { %1396 = vmatprep.subr.bf16.mxu0 %v2694_v7  ;;  %v2827_v7 = vld [vmem:[#allocation8 + $0x90] ss:$8 sps:$4 sm:$0xff]   ;;  %v2751_v9 = vld [vmem:[#allocation6 + $0x40c] ss:$16 sps:$4 sm:$0xff]  }
  0xb5   :  { %1479 = vmatpush1.bf16.msra.mxu1 %v2695_v12  ;;  %v2749_v12 = vld [vmem:[#allocation6 + $0x408] ss:$16 sps:$4 sm:$0xff]  }
  0xb6   :  { %1397 = vmatpush1.bf16.msra.mxu0 %v2692_v10  ;;  %1489 = vmatprep.subr.bf16.mxu1 %v2700_v14  ;;  %v2832_v10 = vld [vmem:[#allocation8 + $0xa4] ss:$8 sps:$4 sm:$0xff]   ;;  %v2830_v14 = vld [vmem:[#allocation8 + $0xa0] ss:$8 sps:$4 sm:$0xff]  }
  0xb7   :  { %1407 = vmatprep.subr.bf16.mxu0 %v2706_v15  ;;  %v2835_v15 = vld [vmem:[#allocation8 + $0xb4] ss:$8 sps:$4 sm:$0xff]  }
  0xb8   :  { %1481 = vmatmul.mubr.bf16.vlgmr.msra.gmra.mrb[4].mxu1 %v3086_v8  ;;  %v2713_v8 = vld [vmem:[#allocation6 + $0x288] ss:$16 sps:$4 sm:$0xff]  }
  0xb9   :  { %1399 = vmatmul.mubr.bf16.vlgmr.msra.gmra.mrb[0].mxu0 %v3096_v16  ;;  %1490 = vmatpush1.bf16.msra.mxu1 %v2698_v17  ;;  %v2752_v17 = vld [vmem:[#allocation6 + $0x428] ss:$16 sps:$4 sm:$0xff]  }
  0xba   :  { %1408 = vmatpush1.bf16.msra.mxu0 %v2704_v18  ;;  %1491 = vmatprep.subr.bf16.mxu1 %v2703_v19  ;;  %v2757_v18 = vld [vmem:[#allocation6 + $0x44c] ss:$16 sps:$4 sm:$0xff]   ;;  %v2833_v19 = vld [vmem:[#allocation8 + $0xb0] ss:$8 sps:$4 sm:$0xff]  }
  0xbb   :  { %1439 = vmatprep.mubr.bf16.mxu0 %v3001_v22  ;;  %1521 = vmatprep.mubr.bf16.mxu1 %v3082_v52  ;;  %v2719_v52 = vld [vmem:[#allocation6 + $0x2c8] ss:$16 sps:$4 sm:$0xff]  }
  0xbc   :  { %2020 = vmatprep.subr.bf16.mxu0 %v2802_v34  ;;  %v2773_v34 = vld [vmem:[#allocation6 + $0x508] ss:$16 sps:$4 sm:$0xff]  }
  0xbd   :  { %1492 = vmatpush1.bf16.msra.mxu1 %v2701_v20  ;;  %v2838_v20 = vld [vmem:[#allocation8 + $0xc4] ss:$8 sps:$4 sm:$0xff]  }
  0xbe   :  { %1493 = vmatprep.subr.bf16.mxu1 %v2709_v21  ;;  %v2755_v21 = vld [vmem:[#allocation6 + $0x448] ss:$16 sps:$4 sm:$0xff]  }
  0xc1   :  { %1494 = vmatpush1.bf16.msra.mxu1 %v2707_v23  ;;  %v2760_v23 = vld [vmem:[#allocation6 + $0x46c] ss:$16 sps:$4 sm:$0xff]  }
  0xc2   :  { %1495 = vmatprep.subr.bf16.mxu1 %v2712_v25  ;;  %v2841_v25 = vld [vmem:[#allocation8 + $0xd4] ss:$8 sps:$4 sm:$0xff]  }
  0xc5   :  { %2396 = vmatmul.mubr.msk.bf16.vlgmr.msra.gmra.mrb[0].mxu0 %vm1280_vm0, %v3102_v27  ;;  %1496 = vmatpush1.bf16.msra.mxu1 %v2710_v26  ;;  %v2763_v26 = vld [vmem:[#allocation6 + $0x48c] ss:$16 sps:$4 sm:$0xff]  }
  0xc6   :  { %1497 = vmatprep.subr.bf16.mxu1 %v2715_v28  ;;  %2021 = vmatpush1.bf16.msra.mxu0 %v2800_v33  ;;  %v2761_v28 = vld [vmem:[#allocation6 + $0x488] ss:$16 sps:$4 sm:$0xff]   ;;  %v2775_v33 = vld [vmem:[#allocation6 + $0x50c] ss:$16 sps:$4 sm:$0xff]  }
  0xc7   :  { %2022 = vmatprep.subr.bf16.mxu0 %v2805_v36  ;;  %v2778_v36 = vld [vmem:[#allocation6 + $0x52c] ss:$16 sps:$4 sm:$0xff]  }
  0xc9   :  { %1498 = vmatpush1.bf16.msra.mxu1 %v2713_v8  ;;  %v2766_v8 = vld [vmem:[#allocation6 + $0x4ac] ss:$16 sps:$4 sm:$0xff]  }
  0xca   :  { %1499 = vmatprep.subr.bf16.mxu1 %v2718_v29  ;;  %2023 = vmatpush1.bf16.msra.mxu0 %v2803_v38  ;;  %v2764_v29 = vld [vmem:[#allocation6 + $0x4a8] ss:$16 sps:$4 sm:$0xff]  }
  0xcb   :  { %2024 = vmatprep.subr.bf16.mxu0 %v2808_v40  ;;  %v2776_v38 = vld [vmem:[#allocation6 + $0x528] ss:$16 sps:$4 sm:$0xff]   ;;  %v2781_v40 = vld [vmem:[#allocation6 + $0x54c] ss:$16 sps:$4 sm:$0xff]  }
  0xcd   :  { %1500 = vmatpush1.bf16.msra.mxu1 %v2716_v30  ;;  %v2769_v30 = vld [vmem:[#allocation6 + $0x4cc] ss:$16 sps:$4 sm:$0xff]  }
  0xce   :  { %1501 = vmatprep.subr.bf16.mxu1 %v2721_v31  ;;  %2025 = vmatpush1.bf16.msra.mxu0 %v2806_v42  ;;  %v2767_v31 = vld [vmem:[#allocation6 + $0x4c8] ss:$16 sps:$4 sm:$0xff]  }
  0xcf   :  { %2026 = vmatprep.subr.bf16.mxu0 %v2811_v44  ;;  %v2779_v42 = vld [vmem:[#allocation6 + $0x548] ss:$16 sps:$4 sm:$0xff]   ;;  %v2784_v44 = vld [vmem:[#allocation6 + $0x56c] ss:$16 sps:$4 sm:$0xff]  }
  0xd1   :  { %1502 = vmatpush1.bf16.msra.mxu1 %v2719_v52  ;;  %v2772_v52 = vld [vmem:[#allocation6 + $0x4ec] ss:$16 sps:$4 sm:$0xff]  }
  0xd2   :  { %1503 = vmatprep.subr.bf16.mxu1 %v2724_v32  ;;  %2027 = vmatpush1.bf16.msra.mxu0 %v2809_v46  ;;  %v2770_v32 = vld [vmem:[#allocation6 + $0x4e8] ss:$16 sps:$4 sm:$0xff]   ;;  %v2787_v46 = vld [vmem:[#allocation6 + $0x58c] ss:$16 sps:$4 sm:$0xff]  }
  0xd3   :  { %2028 = vmatprep.subr.bf16.mxu0 %v2814_v48  ;;  %v2785_v48 = vld [vmem:[#allocation6 + $0x588] ss:$16 sps:$4 sm:$0xff]  }
  0xd5   :  { %1504 = vmatpush1.bf16.msra.mxu1 %v2722_v37  ;;  %v2844_v37 = vld [vmem:[#allocation8 + $0xe4] ss:$8 sps:$4 sm:$0xff]  }
  0xd6   :  { %1505 = vmatprep.subr.bf16.mxu1 %v2727_v39  ;;  %2029 = vmatpush1.bf16.msra.mxu0 %v2812_v50  ;;  %v2842_v39 = vld [vmem:[#allocation8 + $0xe0] ss:$8 sps:$4 sm:$0xff]  }
  0xd7   :  { %2030 = vmatprep.subr.bf16.mxu0 %v2817_v53  ;;  %v2788_v50 = vld [vmem:[#allocation6 + $0x5a8] ss:$16 sps:$4 sm:$0xff]  }
  0xd8   :  { %v2791_v53 = vld [vmem:[#allocation6 + $0x5c8] ss:$16 sps:$4 sm:$0xff]  }
  0xd9   :  { %1506 = vmatpush1.bf16.msra.mxu1 %v2725_v41  ;;  %v2847_v41 = vld [vmem:[#allocation8 + $0xf4] ss:$8 sps:$4 sm:$0xff]  }
  0xda   :  { %1507 = vmatprep.subr.bf16.mxu1 %v2730_v43  ;;  %2031 = vmatpush1.bf16.msra.mxu0 %v2815_v55  ;;  %v2845_v43 = vld [vmem:[#allocation8 + $0xf0] ss:$8 sps:$4 sm:$0xff]  }
  0xdb   :  { %2032 = vmatprep.subr.bf16.mxu0 %v2820_v57  ;;  %v2794_v55 = vld [vmem:[#allocation6 + $0x5e8] ss:$16 sps:$4 sm:$0xff]  }
  0xdc   :  { %v2797_v57 = vld [vmem:[#allocation6 + $0x608] ss:$16 sps:$4 sm:$0xff]  }
  0xdd   :  { %1508 = vmatpush1.bf16.msra.mxu1 %v2728_v45  ;;  %v2782_v45 = vld [vmem:[#allocation6 + $0x568] ss:$16 sps:$4 sm:$0xff]  }
  0xde   :  { %1509 = vmatprep.subr.bf16.mxu1 %v2733_v47  ;;  %2033 = vmatpush1.bf16.msra.mxu0 %v2818_v59  ;;  %v2850_v47 = vld [vmem:[#allocation8 + $0x104] ss:$8 sps:$4 sm:$0xff]  }
  0xdf   :  { %2034 = vmatprep.subr.bf16.mxu0 %v2823_v61 }
  0xe1   :  { %1510 = vmatpush1.bf16.msra.mxu1 %v2731_v49  ;;  %v2790_v49 = vld [vmem:[#allocation6 + $0x5ac] ss:$16 sps:$4 sm:$0xff]  }
  0xe2   :  { %1511 = vmatprep.subr.bf16.mxu1 %v2736_v51  ;;  %2035 = vmatpush1.bf16.msra.mxu0 %v2821_v63  ;;  %v2793_v51 = vld [vmem:[#allocation6 + $0x5cc] ss:$16 sps:$4 sm:$0xff]  }
  0xe3   :  { %2036 = vmatprep.subr.bf16.mxu0 %v2826_v1  ;;  %v3118_v1 = vld [vmem:[%s3159_s2] sm:$0xf] }
  0xe5   :  { %1512 = vmatpush1.bf16.msra.mxu1 %v2734_v54  ;;  %v2796_v54 = vld [vmem:[#allocation6 + $0x5ec] ss:$16 sps:$4 sm:$0xff]  }
  0xe6   :  { %1513 = vmatprep.subr.bf16.mxu1 %v2739_v56  ;;  %2037 = vmatpush1.bf16.msra.mxu0 %v2824_v3  ;;  %v2799_v56 = vld [vmem:[#allocation6 + $0x60c] ss:$16 sps:$4 sm:$0xff]  }
  0xe7   :  { %2038 = vmatprep.subr.bf16.mxu0 %v2829_v5 }
  0xe9   :  { %1514 = vmatpush1.bf16.msra.mxu1 %v2737_v58 }
  0xea   :  { %1515 = vmatprep.subr.bf16.mxu1 %v2742_v60  ;;  %2039 = vmatpush1.bf16.msra.mxu0 %v2827_v7 }
  0xeb   :  { %2040 = vmatprep.subr.bf16.mxu0 %v2832_v10 }
  0xed   :  { %1516 = vmatpush1.bf16.msra.mxu1 %v2740_v62  ;;  %v280_v62 = vlaneseq }
  0xee   :  { %1517 = vmatprep.subr.bf16.mxu1 %v2745_v0  ;;  %2041 = vmatpush1.bf16.msra.mxu0 %v2830_v14 }
  0xef   :  { %2042 = vmatprep.subr.bf16.mxu0 %v2835_v15  ;;  %v3112_v63 = vshrl.u32 %v280_v62, 7 }
  0xf1   :  { %1518 = vmatpush1.bf16.msra.mxu1 %v2743_v2  ;;  %v282_v0 = vsub.s32 0, %v3112_v63 }
  0xf2   :  { %1519 = vmatprep.subr.bf16.mxu1 %v2748_v4  ;;  %2043 = vmatpush1.bf16.msra.mxu0 %v2833_v19 }
  0xf3   :  { %2044 = vmatprep.subr.bf16.mxu0 %v2838_v20  ;;  %v2853_v20 = vld [vmem:[#allocation8 + $0x114] ss:$8 sps:$4 sm:$0xff]  }
  0xf5   :  { %1520 = vmatpush1.bf16.msra.mxu1 %v2746_v6 }
  0xf6   :  { %1530 = vmatprep.subr.bf16.mxu1 %v2751_v9  ;;  %2045 = vmatpush1.bf16.msra.mxu0 %v2836_v24  ;;  %v2854_v24 = vld [vmem:[#allocation8 + $0x120] ss:$8 sps:$4 sm:$0xff]  }
  0xf7   :  { %2046 = vmatprep.subr.bf16.mxu0 %v2841_v25  ;;  %v2859_v25 = vld [vmem:[#allocation8 + $0x134] ss:$8 sps:$4 sm:$0xff]  }
  0xf8   :  { %1522 = vmatmul.mubr.bf16.vlgmr.msra.gmra.mrb[4].mxu1 %v3088_v11  ;;  %v2758_v11 = vld [vmem:[#allocation6 + $0x468] ss:$16 sps:$4 sm:$0xff]  }
  0xf9   :  { %1531 = vmatpush1.bf16.msra.mxu1 %v2749_v12  ;;  %1562 = vmatprep.mubr.bf16.mxu1 %v3093_v35  ;;  %v2839_v35 = vld [vmem:[#allocation8 + $0xd0] ss:$8 sps:$4 sm:$0xff]  }
  0xfa   :  { %1532 = vmatprep.subr.bf16.mxu1 %v2754_v13  ;;  %2047 = vmatpush1.bf16.msra.mxu0 %v2839_v35  ;;  %v2860_v35 = vld [vmem:[#allocation8 + $0x140] ss:$8 sps:$4 sm:$0xff]  }
  0xfb   :  { %2048 = vmatprep.subr.bf16.mxu0 %v2844_v37  ;;  %v2880_v37 = vld [vmem:[#allocation8 + $0x1a4] ss:$8 sps:$4 sm:$0xff]  }
  0xfd   :  { %1533 = vmatpush1.bf16.msra.mxu1 %v2752_v17 }
  0xfe   :  { %1534 = vmatprep.subr.bf16.mxu1 %v2757_v18  ;;  %2049 = vmatpush1.bf16.msra.mxu0 %v2842_v39  ;;  %v2848_v18 = vld [vmem:[#allocation8 + $0x100] ss:$8 sps:$4 sm:$0xff]   ;;  %v2883_v39 = vld [vmem:[#allocation8 + $0x1b4] ss:$8 sps:$4 sm:$0xff]  }
  0xff   :  { %2050 = vmatprep.subr.bf16.mxu0 %v2847_v41  ;;  %v2886_v41 = vld [vmem:[#allocation8 + $0x1c4] ss:$8 sps:$4 sm:$0xff]  }
 0x101   :  { %1535 = vmatpush1.bf16.msra.mxu1 %v2755_v21  ;;  %v2851_v21 = vld [vmem:[#allocation8 + $0x110] ss:$8 sps:$4 sm:$0xff]  }
 0x102   :  { %1536 = vmatprep.subr.bf16.mxu1 %v2760_v23  ;;  %2051 = vmatpush1.bf16.msra.mxu0 %v2845_v43  ;;  %v2856_v23 = vld [vmem:[#allocation8 + $0x124] ss:$8 sps:$4 sm:$0xff]   ;;  %v2889_v43 = vld [vmem:[#allocation8 + $0x1d4] ss:$8 sps:$4 sm:$0xff]  }
 0x103   :  { %2061 = vmatprep.subr.bf16.mxu0 %v2850_v47  ;;  %v2895_v47 = vld [vmem:[#allocation8 + $0x1f4] ss:$8 sps:$4 sm:$0xff]  }
 0x105   :  { %1537 = vmatpush1.bf16.msra.mxu1 %v2758_v11  ;;  %v2857_v11 = vld [vmem:[#allocation8 + $0x130] ss:$8 sps:$4 sm:$0xff]  }
 0x106   :  { %1538 = vmatprep.subr.bf16.mxu1 %v2763_v26  ;;  %v2862_v26 = vld [vmem:[#allocation8 + $0x144] ss:$8 sps:$4 sm:$0xff]  }
 0x109   :  { %1539 = vmatpush1.bf16.msra.mxu1 %v2761_v28  ;;  %v2865_v28 = vld [vmem:[#allocation8 + $0x154] ss:$8 sps:$4 sm:$0xff]  }
 0x10a   :  { %1540 = vmatprep.subr.bf16.mxu1 %v2766_v8  ;;  %v2863_v8 = vld [vmem:[#allocation8 + $0x150] ss:$8 sps:$4 sm:$0xff]  }
 0x10d   :  { %1541 = vmatpush1.bf16.msra.mxu1 %v2764_v29  ;;  %v2868_v29 = vld [vmem:[#allocation8 + $0x164] ss:$8 sps:$4 sm:$0xff]  }
 0x10e   :  { %1542 = vmatprep.subr.bf16.mxu1 %v2769_v30  ;;  %v2866_v30 = vld [vmem:[#allocation8 + $0x160] ss:$8 sps:$4 sm:$0xff]  }
 0x111   :  { %1543 = vmatpush1.bf16.msra.mxu1 %v2767_v31  ;;  %v2871_v31 = vld [vmem:[#allocation8 + $0x174] ss:$8 sps:$4 sm:$0xff]  }
 0x112   :  { %1544 = vmatprep.subr.bf16.mxu1 %v2772_v52  ;;  %v2869_v52 = vld [vmem:[#allocation8 + $0x170] ss:$8 sps:$4 sm:$0xff]  }
 0x115   :  { %1545 = vmatpush1.bf16.msra.mxu1 %v2770_v32  ;;  %v2874_v32 = vld [vmem:[#allocation8 + $0x184] ss:$8 sps:$4 sm:$0xff]  }
 0x116   :  { %1546 = vmatprep.subr.bf16.mxu1 %v2775_v33  ;;  %v2872_v33 = vld [vmem:[#allocation8 + $0x180] ss:$8 sps:$4 sm:$0xff]  }
 0x119   :  { %1547 = vmatpush1.bf16.msra.mxu1 %v2773_v34  ;;  %v2877_v34 = vld [vmem:[#allocation8 + $0x194] ss:$8 sps:$4 sm:$0xff]  }
 0x11a   :  { %1548 = vmatprep.subr.bf16.mxu1 %v2778_v36  ;;  %v2875_v36 = vld [vmem:[#allocation8 + $0x190] ss:$8 sps:$4 sm:$0xff]  }
 0x11d   :  { %1549 = vmatpush1.bf16.msra.mxu1 %v2776_v38  ;;  %v2878_v38 = vld [vmem:[#allocation8 + $0x1a0] ss:$8 sps:$4 sm:$0xff]  }
 0x11e   :  { %1550 = vmatprep.subr.bf16.mxu1 %v2781_v40  ;;  %v2881_v40 = vld [vmem:[#allocation8 + $0x1b0] ss:$8 sps:$4 sm:$0xff]  }
 0x121   :  { %1551 = vmatpush1.bf16.msra.mxu1 %v2779_v42  ;;  %v2884_v42 = vld [vmem:[#allocation8 + $0x1c0] ss:$8 sps:$4 sm:$0xff]  }
 0x122   :  { %1552 = vmatprep.subr.bf16.mxu1 %v2784_v44  ;;  %v2887_v44 = vld [vmem:[#allocation8 + $0x1d0] ss:$8 sps:$4 sm:$0xff]  }
 0x125   :  { %1553 = vmatpush1.bf16.msra.mxu1 %v2782_v45  ;;  %v2892_v45 = vld [vmem:[#allocation8 + $0x1e4] ss:$8 sps:$4 sm:$0xff]  }
 0x126   :  { %1554 = vmatprep.subr.bf16.mxu1 %v2787_v46  ;;  %v2890_v46 = vld [vmem:[#allocation8 + $0x1e0] ss:$8 sps:$4 sm:$0xff]  }
 0x129   :  { %1555 = vmatpush1.bf16.msra.mxu1 %v2785_v48  ;;  %v2893_v48 = vld [vmem:[#allocation8 + $0x1f0] ss:$8 sps:$4 sm:$0xff]  }
 0x12a   :  { %1556 = vmatprep.subr.bf16.mxu1 %v2790_v49  ;;  %v290_v49 = vsub.s32 2, %v3112_v63 }
 0x12d   :  { %1557 = vmatpush1.bf16.msra.mxu1 %v2788_v50  ;;  %v294_v50 = vsub.s32 3, %v3112_v63 }
 0x12e   :  { %1558 = vmatprep.subr.bf16.mxu1 %v2793_v51  ;;  %v291_v51 = vrot.slane %v3118_v1, %v290_v49 }
 0x131   :  { %1559 = vmatpush1.bf16.msra.mxu1 %v2791_v53  ;;  %v295_v53 = vrot.slane %v3118_v1, %v294_v50 }
 0x132   :  { %1560 = vmatprep.subr.bf16.mxu1 %v2796_v54 }
 0x135   :  { %1561 = vmatpush1.bf16.msra.mxu1 %v2794_v55 }
 0x136   :  { %1571 = vmatprep.subr.bf16.mxu1 %v2799_v56 }
 0x138   :  { %1563 = vmatmul.mubr.bf16.vlgmr.msra.gmra.mrb[4].mxu1 %v3096_v16  ;;  %v286_v16 = vsub.s32 1, %v3112_v63 }
 0x139   :  { %1572 = vmatpush1.bf16.msra.mxu1 %v2797_v57  ;;  %1603 = vmatprep.mubr.bf16.mxu1 %v3001_v22  ;;  %v283_v22 = vrot.slane %v3118_v1, %v282_v0 }
 0x144   :  { %2397 = vmatmul.mubr.msk.bf16.vlgmr.msra.gmra.mrb[4].mxu1 %vm1280_vm0, %v3102_v27  ;;  %v287_v27 = vrot.slane %v3118_v1, %v286_v16  ;;  %v2462_v1 = vld.sshfl [vmem:[%s3162_s5] sm:$0x11 pattern:$0x75316420] }
 0x14b   :  { %v1318_v58 = vpop.f32.mrb[0].mxu1 }
 0x14c   :  { %v1320_v59 = vpop.f32.mrb[1].mxu1  ;;  %v1319_v2 = vadd.f32 %v1318_v58, %v283_v22 }
 0x14d   :  { %v1322_v60 = vpop.f32.mrb[2].mxu1  ;;  %v1321_v3 = vadd.f32 %v1320_v59, %v287_v27 }
 0x14e   :  { %v1323_v61 = vpop.f32.mrb[3].mxu1 }
 0x198   :  { %v1441_v4 = vpop.f32.mrb[0].mxu0 }
 0x199   :  { %v2465_v5 = vadd.f32 %v1441_v4, %v1319_v2  ;;  %v1443_v6 = vpop.f32.mrb[1].mxu0 }
 0x19a   :  { %v2467_v7 = vadd.f32 %v1443_v6, %v1321_v3  ;;  %v1445_v9 = vpop.f32.mrb[2].mxu0  ;;  %v3002_v3 = vmov 1966171168   ;;  %v2119_v6 = vcombine.high %v2462_v1, %v2462_v1 }
 0x19b   :  { %v1612_v10 = vmul.f32 0.2, %v2465_v5  ;;  %v1446_v12 = vpop.f32.mrb[3].mxu0  ;;  %v2121_v4 = vunpack.c.l.s4 %v3002_v3 }
 0x19c   :  { %v1613_v13 = vmul.f32 0.2, %v2467_v7  ;;  %v1688_v12 = vld [vmem:[%s3161_s4] sm:$0x3] }
 0x19d   :  { %v1616_v14 = vmax.f32 %v2465_v5, %v1612_v10  ;;  %v2122_v5 = vunpack.c.0.s8 %v2121_v4 }
 0x19e   :  { %v1617_v15 = vmax.f32 %v2467_v7, %v1613_v13  ;;  %v1693_v13 = vrot.slane %v1688_v12, %v282_v0 }
 0x19f   :  { %v1620_v19 = vpack.c.bf16 %v1616_v14, %v1616_v14  ;;  %v2125_v7 = vsub.s32 %v2122_v5, %v3112_v63  ;;  %v1697_v14 = vrot.slane %v1688_v12, %v286_v16  ;;  %v2110_v63 = vstv %s3163_s6 }
 0x1a0   :  { %v1621_v17 = vpack.c.bf16 %v1617_v15, %v1617_v15 }
 0x1a1   :  { %v2133_v9 = vrot.slane %v2119_v6, %v2125_v7  ;;  %v2126_v10 = vrot.slane %v2462_v1, %v2125_v7 }
 0x1a2   :  { %2052 = vmatprep.mubr.bf16.mxu0 %v1621_v17 }
 0x1a3   :  { %2053 = vmatmul.mubr.bf16.vlgmr.msra.gmra.mrb[4].mxu0 %v1620_v19  ;;  %2168 = vmatprep.mubr.bf16.mxu1 %v2133_v9 }
 0x1a4   :  { %2062 = vmatpush1.bf16.msra.mxu0 %v2848_v18 }
 0x1a5   :  { %2063 = vmatprep.subr.bf16.mxu0 %v2853_v20 }
 0x1a8   :  { %2064 = vmatpush1.bf16.msra.mxu0 %v2851_v21 }
 0x1a9   :  { %2065 = vmatprep.subr.bf16.mxu0 %v2856_v23 }
 0x1ac   :  { %2066 = vmatpush1.bf16.msra.mxu0 %v2854_v24 }
 0x1ad   :  { %2067 = vmatprep.subr.bf16.mxu0 %v2859_v25 }
 0x1b0   :  { %2068 = vmatpush1.bf16.msra.mxu0 %v2857_v11 }
 0x1b1   :  { %2069 = vmatprep.subr.bf16.mxu0 %v2862_v26 }
 0x1b4   :  { %2070 = vmatpush1.bf16.msra.mxu0 %v2860_v35 }
 0x1b5   :  { %2071 = vmatprep.subr.bf16.mxu0 %v2865_v28 }
 0x1b8   :  { %2072 = vmatpush1.bf16.msra.mxu0 %v2863_v8 }
 0x1b9   :  { %2073 = vmatprep.subr.bf16.mxu0 %v2868_v29 }
 0x1bc   :  { %2074 = vmatpush1.bf16.msra.mxu0 %v2866_v30 }
 0x1bd   :  { %2075 = vmatprep.subr.bf16.mxu0 %v2871_v31 }
 0x1c0   :  { %2076 = vmatpush1.bf16.msra.mxu0 %v2869_v52 }
 0x1c1   :  { %2077 = vmatprep.subr.bf16.mxu0 %v2874_v32 }
 0x1c4   :  { %2078 = vmatpush1.bf16.msra.mxu0 %v2872_v33 }
 0x1c5   :  { %2079 = vmatprep.subr.bf16.mxu0 %v2877_v34 }
 0x1c8   :  { %2080 = vmatpush1.bf16.msra.mxu0 %v2875_v36 }
 0x1c9   :  { %2081 = vmatprep.subr.bf16.mxu0 %v2880_v37 }
 0x1cc   :  { %2082 = vmatpush1.bf16.msra.mxu0 %v2878_v38 }
 0x1cd   :  { %2083 = vmatprep.subr.bf16.mxu0 %v2883_v39 }
 0x1d0   :  { %2084 = vmatpush1.bf16.msra.mxu0 %v2881_v40 }
 0x1d1   :  { %2085 = vmatprep.subr.bf16.mxu0 %v2886_v41 }
 0x1d4   :  { %2086 = vmatpush1.bf16.msra.mxu0 %v2884_v42 }
 0x1d5   :  { %2087 = vmatprep.subr.bf16.mxu0 %v2889_v43 }
 0x1d8   :  { %2088 = vmatpush1.bf16.msra.mxu0 %v2887_v44 }
 0x1d9   :  { %2089 = vmatprep.subr.bf16.mxu0 %v2892_v45 }
 0x1dc   :  { %2090 = vmatpush1.bf16.msra.mxu0 %v2890_v46 }
 0x1dd   :  { %2091 = vmatprep.subr.bf16.mxu0 %v2895_v47 }
 0x1e0   :  { %2092 = vmatpush1.bf16.msra.mxu0 %v2893_v48 }
 0x217   :  { %v1605_v54 = vpop.f32.mrb[4].mxu1 }
 0x218   :  { %v2468_v55 = vadd.f32 %v1605_v54, %v291_v51  ;;  %v1607_v56 = vpop.f32.mrb[5].mxu1 }
 0x219   :  { %v2469_v57 = vadd.f32 %v1607_v56, %v295_v53  ;;  %v1609_v58 = vpop.f32.mrb[6].mxu1 }
 0x21a   :  { %v1614_v59 = vmul.f32 0.2, %v2468_v55  ;;  %v1610_v60 = vpop.f32.mrb[7].mxu1 }
 0x21b   :  { %v1615_v61 = vmul.f32 0.2, %v2469_v57 }
 0x21c   :  { %v1618_v62 = vmax.f32 %v2468_v55, %v1614_v59 }
 0x21d   :  { %v1619_v22 = vmax.f32 %v2469_v57, %v1615_v61 }
 0x21e   :  { %v1622_v2 = vpack.c.bf16 %v1618_v62, %v1618_v62 }
 0x21f   :  { %v1623_v27 = vpack.c.bf16 %v1619_v22, %v1619_v22 }
 0x221   :  { %2093 = vmatprep.mubr.bf16.mxu0 %v1623_v27 }
 0x222   :  { %2094 = vmatmul.mubr.bf16.vlgmr.msra.gmra.mrb[4].mxu0 %v1622_v2 }
 0x2f5   :  { %v2095_v15 = vpop.f32.mrb[4].mxu0 }
 0x2f6   :  { %v2470_v17 = vadd.f32 %v2095_v15, %v1693_v13  ;;  %v2097_v18 = vpop.f32.mrb[5].mxu0 }
 0x2f7   :  { %v2471_v19 = vadd.f32 %v2097_v18, %v1697_v14  ;;  %v2099_v20 = vpop.f32.mrb[6].mxu0 }
 0x2f8   :  { %v2102_v21 = vmul.f32 0.2, %v2470_v17  ;;  %v2100_v23 = vpop.f32.mrb[7].mxu0 }
 0x2f9   :  { %v2103_v24 = vmul.f32 0.2, %v2471_v19 }
 0x2fa   :  { %v2104_v25 = vmax.f32 %v2470_v17, %v2102_v21 }
 0x2fb   :  { %v2105_v11 = vmax.f32 %v2471_v19, %v2103_v24 }
 0x2fc   :  { %v2106_v35 = vpack.c.bf16 %v2104_v25, %v2104_v25 }
 0x2fd   :  { %v2107_v26 = vpack.c.bf16 %v2105_v11, %v2105_v11 }
 0x2ff   :  { %2136 = vmatprep.subr.bf16.mxu1 %v2107_v26 }
 0x300   :  { %2137 = vmatpush1.bf16.xpose.msra.mxu1 %v2106_v35 }
 0x307   :  { %2169 = vmatmul.mubr.bf16.vlgmr.msra.gmra.mrb[8].mxu1 %v2126_v10 }
 0x3da   :  { %v2170_v0 = vpop.f32.mrb[8].mxu1 }
 0x3db   :  { %v2171_v16 = vadd.f32 %v2170_v0, %v2110_v63  ;;  %v2172_v28 = vpop.f32.mrb[9].mxu1 }
 0x3dc   :  { %v2173_v8 = vpop.f32.mrb[10].mxu1 }
 0x3dd   :  { %v2463_v29 = vmul.f32 -1.442695, %v2171_v16  ;;  %v2174_v30 = vpop.f32.mrb[11].mxu1 }
 0x3df   :  { %2896 = vpow2.f32 %v2463_v29 }
 0x3e9   :  { %v2897_v31 = vpop.eup %2896 }
 0x3ea   :  { %v2179_v52 = vadd.f32 1.0, %v2897_v31 }
 0x3ec   :  { %2898 = vrcp.f32 %v2179_v52 }
 0x3f6   :  { %v2899_v32 = vpop.eup %2898 }
 0x3f7   :  { %2183 = vst.msk [vmem:[#allocation9] sm:$0x1] %vm2182_vm1, %v2899_v32 }
 0x3f8   :  { %2977 = shalt.err (!%p2974_p0)
}
 0x3f9   :  { %s2978_s26 = scalar_lea.hbm %s3164_s7, 16 }
 0x3fa   :  { %p2979_p1 = scmp.ne.s32.totalorder %s3164_s7, %s2978_s26  ;;  %p2982_p2 = scmp.lt.u32.totalorder %s2978_s26, %s3164_s7 }
 0x3fc   :  { %p2984_p3 = pnand %p2982_p2, %p2979_p1 }
 0x3fe   :  { %2987 = shalt.err (!%p2984_p3)
}
 0x3ff   :  { %2193 = dma.vmem_to_hbm [thread:$0]  %s2191_s21, 16, %s3164_s7, [#allocation5]  }
 0x400   :  { %2992 = dma.done.wait [#allocation5], 16  }
 0x401   :  { %2993 = vsyncadd [#allocation5], 4294967280 }
 0x402   :  { %2197 = vsyncpa [#allocation4], 1 }
 0x403   :  { %2198 = vsyncpa [#allocation7], 1 }
 0x404   :  { %2199 = vsyncpa [#allocation5], 1 }

</bundles_post_ra>
